<compile_context>
chip_gen: v7x
topology: tpu7x:2x2x1
jax: 0.10.0
libtpu: 0.0.40
codegen_flags: <defaults>
</compile_context>

<pallas_src>
import jax
import jax.numpy as jnp
from jax.experimental import pallas as pl
from jax.experimental.pallas import tpu as pltpu


def _round_up(x, m):
    return (x + m - 1) // m * m


def conv_transform_kernel(x_ref, cb_ref, a_ref, w1_ref, b1_ref, w2_ref, b2_ref, out_ref):
    # x_ref : (TR, P*C*L) f32 VMEM   packed input (P batch rows per lane-dense row)
    # cb_ref: (1, 1)      f32 SMEM   Conv1d bias scalar
    # a_ref : (P*C*L, P*L)           block-diag "conv as matmul" weight
    # w1_ref: (P*L, P*H)             block-diag fc1 weight
    # b1_ref: (1, P*H)               fc1 bias (tiled P times)
    # w2_ref: (P*H, Wout)            block-diag fc2 weight (zero-padded to Wout lanes)
    # b2_ref: (1, Wout)              fc2 bias (tiled P times, zero in padded lanes)
    # out_ref:(TR, Wout)             packed output rows (no padding when L % 16 == 0)

    # Conv1d(C -> 1, kernel_size=1) + bias + ReLU, expressed as a tiny block-diagonal
    # matmul on the packed layout (MXU has huge slack; kernel is HBM-bound).
    conv = jnp.dot(x_ref[...], a_ref[...], preferred_element_type=jnp.float32)
    conv = jnp.maximum(conv + cb_ref[0, 0], 0.0)

    # x.view(N, -1) is a no-op for out_channels=1.  SimpleMLP: fc1 -> ReLU -> fc2.
    h = jnp.dot(conv, w1_ref[...], preferred_element_type=jnp.float32)
    h = jnp.maximum(h + b1_ref[...], 0.0)
    out = jnp.dot(h, w2_ref[...], preferred_element_type=jnp.float32)
    out_ref[...] = out + b2_ref[...]


def conv_transform(x_ncl, conv_weight, conv_bias, fc1_weight, fc1_bias, fc2_weight,
                   fc2_bias, *, tile_rows=1024):
    """Forward pass of ConvolutionalTransform.

    Parameters use the raw PyTorch layouts (explicit checks per review):
      x_ncl      : (N, C, L)   Conv1d input
      conv_weight: (1, C, 1)   nn.Conv1d(C, 1, 1).weight
      conv_bias  : (1,)        nn.Conv1d bias
      fc1_weight : (H, L)      nn.Linear(L, H).weight        fc1_bias: (H,)
      fc2_weight : (L, H)      nn.Linear(H, L).weight        fc2_bias: (L,)
    Returns (N, L) float32.
    """
    N, C, L = x_ncl.shape
    H = fc1_weight.shape[0]
    assert conv_weight.shape == (1, C, 1), conv_weight.shape
    assert conv_bias.shape == (1,), conv_bias.shape
    assert fc1_weight.shape == (H, L) and fc1_bias.shape == (H,)
    assert fc2_weight.shape == (L, H) and fc2_bias.shape == (L,)

    f32 = jnp.float32
    cw = conv_weight.reshape(C).astype(f32)
    cb = conv_bias.reshape(1, 1).astype(f32)
    w1 = fc1_weight.T.astype(f32)                      # (L, H)
    b1 = fc1_bias.astype(f32)
    w2 = fc2_weight.T.astype(f32)                      # (H, L)
    b2 = fc2_bias.astype(f32)

    LANE = 128
    # Pack P batch rows per lane-dense row; P=8 makes P*L a multiple of 128 when
    # L % 16 == 0, so the output store carries no padding bytes.
    P = 8 if (8 * L) % LANE == 0 else 1
    # TODO(synk): for L % 16 != 0 we fall back to P=1 (lane-padded output writeback).
    Win = P * C * L                                    # packed input row width
    Wcv = P * L                                        # conv / fc1-input width
    Whid = P * H                                       # packed hidden width
    Wout = _round_up(P * L, LANE)                      # lane-dense output width

    # Block-diagonal weights (built once; zero padding is numerically exact).
    eye_p = jnp.eye(P, dtype=f32)
    s_conv = (cw[:, None, None] * jnp.eye(L, dtype=f32)).reshape(C * L, L)
    a_blk = jnp.kron(eye_p, s_conv)                                        # (Win, Wcv)
    w1_blk = jnp.kron(eye_p, w1)                                           # (Wcv, Whid)
    b1_row = jnp.tile(b1[None, :], (1, P))                                 # (1, Whid)
    w2_blk = jnp.zeros((Whid, Wout), f32).at[:, :P * L].set(jnp.kron(eye_p, w2))
    b2_row = jnp.zeros((1, Wout), f32).at[:, :P * L].set(jnp.tile(b2[None, :], (1, P)))

    # Flatten + pack x (free contiguous reshapes).  Batch is padded only up to a
    # multiple of P (nothing at all when N % P == 0).
    x_flat = x_ncl.astype(f32).reshape(N, C * L)
    rows = pl.cdiv(N, P)
    n_pad = rows * P
    if n_pad != N:
        x_flat = jnp.pad(x_flat, ((0, n_pad - N), (0, 0)))
    x_packed = x_flat.reshape(rows, Win)

    # Tile the packed-row axis.  1024 packed rows = 8192 batch rows (~1.5 MiB of x per
    # step at C=3, L=16) -- amortizes per-grid-step overhead, fits easily in VMEM.
    tr = min(tile_rows, rows)
    if tr < rows:
        tr = max(8, tr - tr % 8)                       # sublane-aligned unless full-extent
    grid = (pl.cdiv(rows, tr),)                        # ragged last tile masked by Pallas

    def const(shape):
        n = len(shape)
        return pl.BlockSpec(shape, lambda i: (0,) * n)

    out_packed = pl.pallas_call(
        conv_transform_kernel,
        out_shape=jax.ShapeDtypeStruct((rows, Wout), f32),
        grid=grid,
        in_specs=[
            pl.BlockSpec((tr, Win), lambda i: (i, 0)),           # x: streamed packed rows
            pl.BlockSpec(memory_space=pltpu.MemorySpace.SMEM),   # conv bias scalar
            const((Win, Wcv)),                                   # conv-as-matmul weight
            const((Wcv, Whid)),                                  # fc1 block-diag weight
            const((1, Whid)),                                    # fc1 bias row
            const((Whid, Wout)),                                 # fc2 block-diag weight
            const((1, Wout)),                                    # fc2 bias row
        ],
        out_specs=pl.BlockSpec((tr, Wout), lambda i: (i, 0)),
        compiler_params=pltpu.CompilerParams(
            # v7x: shard the batch-tile grid across both TensorCores (no-op on v5e/v6e).
            dimension_semantics=("parallel",),
        ),
    )(x_packed, cb, a_blk, w1_blk, b1_row, w2_blk, b2_row)

    # Unpack: free contiguous reshape when P*L == Wout; the [:N] slice only triggers
    # when N % P != 0.
    out = out_packed[:, :P * L].reshape(n_pad, L)
    return out[:N] if n_pad != N else out


def reference(x_ncl, conv_weight, conv_bias, fc1_weight, fc1_bias, fc2_weight, fc2_bias):
    # Plain-JAX reference mirroring the PyTorch forward exactly.
    conv = jnp.einsum("ncl,c->nl", x_ncl, conv_weight[0, :, 0]) + conv_bias[0]
    conv = jnp.maximum(conv, 0.0)
    h = jnp.maximum(conv @ fc1_weight.T + fc1_bias, 0.0)
    return h @ fc2_weight.T + fc2_bias


if __name__ == "__main__":
    # batch, input_channels, fc_out_features (= Conv1d length), MLP hidden
    N, C, L, H = 2, 3, 16, 10

    key = jax.random.PRNGKey(0)
    kx, k0, k1, k2, k3, k4, k5 = jax.random.split(key, 7)

    x = jax.random.normal(kx, (N, C, L), dtype=jnp.float32)

    # Deterministic synthetic parameters in raw PyTorch layouts.
    conv_weight = jax.random.normal(k0, (1, C, 1), dtype=jnp.float32) * 0.5
    conv_bias = jax.random.normal(k1, (1,), dtype=jnp.float32) * 0.1
    fc1_weight = jax.random.normal(k2, (H, L), dtype=jnp.float32) * 0.2
    fc1_bias = jax.random.normal(k3, (H,), dtype=jnp.float32) * 0.1
    fc2_weight = jax.random.normal(k4, (L, H), dtype=jnp.float32) * 0.2
    fc2_bias = jax.random.normal(k5, (L,), dtype=jnp.float32) * 0.1

    out = conv_transform(x, conv_weight, conv_bias, fc1_weight, fc1_bias,
                         fc2_weight, fc2_bias)
    out = jax.block_until_ready(out)

    ref = reference(x, conv_weight, conv_bias, fc1_weight, fc1_bias, fc2_weight, fc2_bias)
    assert out.shape == (N, L)
    # MXU f32 matmuls are multi-pass bf16-based -> close to, but not bitwise, f32.
    assert jnp.allclose(out, ref, atol=1e-3, rtol=1e-3), "mismatch vs reference"

    print("KERNEL_OK")
</pallas_src>

<mosaic_0001>
module attributes {stable_mosaic.version = 11 : i64} {
  func.func @conv_transform_kernel(%arg0: i32, %arg1: memref<1x384xf32, #tpu.memory_space<vmem>>, %arg2: memref<1x1xf32, #tpu.memory_space<smem>>, %arg3: memref<384x128xf32, #tpu.memory_space<vmem>>, %arg4: memref<128x80xf32, #tpu.memory_space<vmem>>, %arg5: memref<1x80xf32, #tpu.memory_space<vmem>>, %arg6: memref<80x128xf32, #tpu.memory_space<vmem>>, %arg7: memref<1x128xf32, #tpu.memory_space<vmem>>, %arg8: memref<1x128xf32, #tpu.memory_space<vmem>>) attributes {dimension_semantics = [#tpu.dimension_semantics<parallel>], iteration_bounds = array<i64: 1>, scalar_prefetch = 0 : i64, scratch_operands = 0 : i64, tpu.core_type = #tpu.core_type<tc>, window_params = [{transform_indices = @transform_0, window_bounds = array<i64: 1, 384>}, {transform_indices = @transform_1, window_bounds = array<i64: 1, 1>}, {pipeline_mode = #tpu.pipeline_mode<synchronous>, transform_indices = @transform_2, window_bounds = array<i64: 384, 128>}, {pipeline_mode = #tpu.pipeline_mode<synchronous>, transform_indices = @transform_3, window_bounds = array<i64: 128, 80>}, {pipeline_mode = #tpu.pipeline_mode<synchronous>, transform_indices = @transform_4, window_bounds = array<i64: 1, 80>}, {pipeline_mode = #tpu.pipeline_mode<synchronous>, transform_indices = @transform_5, window_bounds = array<i64: 80, 128>}, {pipeline_mode = #tpu.pipeline_mode<synchronous>, transform_indices = @transform_6, window_bounds = array<i64: 1, 128>}, {transform_indices = @transform_7, window_bounds = array<i64: 1, 128>}]} {
    %c0 = arith.constant 0 : index
    %c0_0 = arith.constant 0 : index
    %0 = vector.load %arg1[%c0, %c0_0] : memref<1x384xf32, #tpu.memory_space<vmem>>, vector<1x384xf32>
    %c0_1 = arith.constant 0 : index
    %c0_2 = arith.constant 0 : index
    %1 = vector.load %arg3[%c0_1, %c0_2] : memref<384x128xf32, #tpu.memory_space<vmem>>, vector<384x128xf32>
    %cst = arith.constant dense<0.000000e+00> : vector<1x128xf32>
    %2 = tpu.matmul %0, %1, %cst {dimension_numbers = #tpu.dot_dimension_numbers<[1], [0], [0], [1], [0, 0, 1, 1], [], []>} : vector<1x384xf32>, vector<384x128xf32>, vector<1x128xf32> -> vector<1x128xf32>
    %c0_3 = arith.constant 0 : index
    %c0_4 = arith.constant 0 : index
    %3 = memref.load %arg2[%c0_3, %c0_4] : memref<1x1xf32, #tpu.memory_space<smem>>
    %4 = vector.broadcast %3 : f32 to vector<1x128xf32>
    %5 = arith.addf %2, %4 : vector<1x128xf32>
    %cst_5 = arith.constant 0.000000e+00 : f32
    %6 = vector.broadcast %cst_5 : f32 to vector<1x128xf32>
    %7 = arith.maximumf %5, %6 : vector<1x128xf32>
    %c0_6 = arith.constant 0 : index
    %c0_7 = arith.constant 0 : index
    %8 = vector.load %arg4[%c0_6, %c0_7] : memref<128x80xf32, #tpu.memory_space<vmem>>, vector<128x80xf32>
    %cst_8 = arith.constant dense<0.000000e+00> : vector<1x80xf32>
    %9 = tpu.matmul %7, %8, %cst_8 {dimension_numbers = #tpu.dot_dimension_numbers<[1], [0], [0], [1], [0, 0, 1, 1], [], []>} : vector<1x128xf32>, vector<128x80xf32>, vector<1x80xf32> -> vector<1x80xf32>
    %c0_9 = arith.constant 0 : index
    %c0_10 = arith.constant 0 : index
    %10 = vector.load %arg5[%c0_9, %c0_10] : memref<1x80xf32, #tpu.memory_space<vmem>>, vector<1x80xf32>
    %11 = arith.addf %9, %10 : vector<1x80xf32>
    %cst_11 = arith.constant 0.000000e+00 : f32
    %12 = vector.broadcast %cst_11 : f32 to vector<1x80xf32>
    %13 = arith.maximumf %11, %12 : vector<1x80xf32>
    %c0_12 = arith.constant 0 : index
    %c0_13 = arith.constant 0 : index
    %14 = vector.load %arg6[%c0_12, %c0_13] : memref<80x128xf32, #tpu.memory_space<vmem>>, vector<80x128xf32>
    %cst_14 = arith.constant dense<0.000000e+00> : vector<1x128xf32>
    %15 = tpu.matmul %13, %14, %cst_14 {dimension_numbers = #tpu.dot_dimension_numbers<[1], [0], [0], [1], [0, 0, 1, 1], [], []>} : vector<1x80xf32>, vector<80x128xf32>, vector<1x128xf32> -> vector<1x128xf32>
    %c0_15 = arith.constant 0 : index
    %c0_16 = arith.constant 0 : index
    %16 = vector.load %arg7[%c0_15, %c0_16] : memref<1x128xf32, #tpu.memory_space<vmem>>, vector<1x128xf32>
    %17 = arith.addf %15, %16 : vector<1x128xf32>
    %c0_17 = arith.constant 0 : index
    %c0_18 = arith.constant 0 : index
    %18 = vector.load %arg8[%c0_17, %c0_18] : memref<1x128xf32, #tpu.memory_space<vmem>>, vector<1x128xf32>
    tpu.vector_store %arg8[%c0_17, %c0_18], %17 {strides = array<i32>} : memref<1x128xf32, #tpu.memory_space<vmem>>, vector<1x128xf32>,
    return
  }
  func.func @transform_0(%arg0: i32) -> (i32, i32) {
    %c0_i32 = arith.constant 0 : i32
    %c0_i32_0 = arith.constant 0 : i32
    return %arg0, %c0_i32 : i32, i32
  }
  func.func @transform_1(%arg0: i32) -> (i32, i32) {
    %c0_i32 = arith.constant 0 : i32
    %c0_i32_0 = arith.constant 0 : i32
    %c0_i32_1 = arith.constant 0 : i32
    return %c0_i32, %c0_i32_0 : i32, i32
  }
  func.func @transform_2(%arg0: i32) -> (i32, i32) {
    %c0_i32 = arith.constant 0 : i32
    %c0_i32_0 = arith.constant 0 : i32
    %c0_i32_1 = arith.constant 0 : i32
    return %c0_i32, %c0_i32_0 : i32, i32
  }
  func.func @transform_3(%arg0: i32) -> (i32, i32) {
    %c0_i32 = arith.constant 0 : i32
    %c0_i32_0 = arith.constant 0 : i32
    %c0_i32_1 = arith.constant 0 : i32
    return %c0_i32, %c0_i32_0 : i32, i32
  }
  func.func @transform_4(%arg0: i32) -> (i32, i32) {
    %c0_i32 = arith.constant 0 : i32
    %c0_i32_0 = arith.constant 0 : i32
    %c0_i32_1 = arith.constant 0 : i32
    return %c0_i32, %c0_i32_0 : i32, i32
  }
  func.func @transform_5(%arg0: i32) -> (i32, i32) {
    %c0_i32 = arith.constant 0 : i32
    %c0_i32_0 = arith.constant 0 : i32
    %c0_i32_1 = arith.constant 0 : i32
    return %c0_i32, %c0_i32_0 : i32, i32
  }
  func.func @transform_6(%arg0: i32) -> (i32, i32) {
    %c0_i32 = arith.constant 0 : i32
    %c0_i32_0 = arith.constant 0 : i32
    %c0_i32_1 = arith.constant 0 : i32
    return %c0_i32, %c0_i32_0 : i32, i32
  }
  func.func @transform_7(%arg0: i32) -> (i32, i32) {
    %c0_i32 = arith.constant 0 : i32
    %c0_i32_0 = arith.constant 0 : i32
    return %arg0, %c0_i32 : i32, i32
  }
}

</mosaic_0001>

<bundles_post_ra>
// kernel: tpu_custom_call.1
= control target key start
LH: loop header
LB: loop body
LE: loop exit
PB: predicated region body
PF: predicated region fallthrough
CT: control target
= control target key end

     0   :  { %13 = vsyncpa [#allocation4], 0  ;;  %s956_s0 = inlined_call_operand.vmem [shape: f32[1,384], index: 0, kind: input, shape index: {}]   ;;  %s957_s1 = inlined_call_operand.<no memory space> [shape: f32[1,1], index: 1, kind: input, shape index: {}]   ;;  %s958_s2 = inlined_call_operand.hbm [shape: f32[384,128], index: 2, kind: input, shape index: {}]   ;;  %s959_s3 = inlined_call_operand.vmem [shape: f32[128,80], index: 3, kind: input, shape index: {}]   ;;  %s960_s4 = inlined_call_operand.vmem [shape: f32[1,80], index: 4, kind: input, shape index: {}]   ;;  %s961_s5 = inlined_call_operand.vmem [shape: f32[80,128], index: 5, kind: input, shape index: {}]   ;;  %s962_s6 = inlined_call_operand.vmem [shape: f32[1,128], index: 6, kind: input, shape index: {}]   ;;  %s963_s7 = inlined_call_operand.hbm [shape: f32[1,128], index: 7, kind: output, shape index: {}]  }
   0x1   :  { %14 = vsyncpa [#allocation5], 0  ;;  %s763_s24 = smov [#allocation3]   ;;  %s715_s28 = scalar_lea.hbm %s958_s2, 6144 }
   0x2   :  { %s24_s25 = sshll.u32 %s763_s24, 4  ;;  %p716_p0 = scmp.ne.s32.totalorder %s958_s2, %s715_s28  ;;  %s25_s25 = int_to_ptr.vmem [resolvable:$true] %s24_s25 }
   0x3   :  { %p719_p1 = scmp.lt.u32.totalorder %s715_s28, %s958_s2 }
   0x5   :  { %p721_p2 = pnand %p719_p1, %p716_p0 }
   0x7   :  { %724 = shalt.err (!%p721_p2)
}
   0x8   :  { %s725_s10 = scalar_lea.vmem %s25_s25, 6144  ;;  %p730_p4 = scmp.lt.s32.totalorder %s25_s25, %s25_s25 }
   0x9   :  { %p726_p3 = scmp.ne.s32.totalorder %s25_s25, %s725_s10  ;;  %p731_p5 = scmp.lt.s32.totalorder %s725_s10, %s725_s10 }
   0xb   :  { %p732_p6 = por %p731_p5, %p730_p4 }
   0xd   :  { %p733_p7 = pnand %p732_p6, %p726_p3 }
   0xf   :  { %736 = shalt.err (!%p733_p7)
}
  0x10   :  { %s764_s11 = smov 128   ;;  %s765_s12 = smov 8  }
  0x11   :  { %30 = dma.hbm_to_vmem [thread:$0]  %s958_s2, 6144, %s25_s25, [#allocation4], %s764_s11, %s764_s11, %s765_s12  }
  0x12   :  { %759 = dma.done.wait [#allocation4], 6144  }
  0x13   :  { %760 = vsyncadd [#allocation4], 4294961152  ;;  %v766_v0 = vmov 0.0|0.0   ;;  %vm767_vm0 = vmmov 0   ;;  %v768_v1 = vmov 0.0   ;;  %v59_v2 = vld [vmem:[#allocation3 + $0x80] sm:$0xff]  ;;  %v94_v20 = vlaneseq }
  0x14   :  { %645 = vmatprep.subr.bf16.mxu1 %v766_v0  ;;  %552 = vmatprep.mubr.msk.f32.mxu1 %vm767_vm0, %v768_v1  ;;  %v60_v3 = vld [vmem:[#allocation3 + $0x88] sm:$0xff]  ;;  %v43_v4 = vld [vmem:[#allocation3] sm:$0xff]  ;;  %v61_v7 = vld [vmem:[#allocation3 + $0x90] sm:$0xff]  ;;  %vm349_vm1 = vcmask 654336   ;;  %s769_s21 = smov [#allocation6]  }
  0x15   :  { %v613_v5 = vpack.c.bf16 %v60_v3, %v59_v2  ;;  %v44_v6 = vld [vmem:[#allocation3 + $0x8] sm:$0xff]  ;;  %v62_v8 = vld [vmem:[#allocation3 + $0x98] sm:$0xff]  ;;  %v45_v11 = vld [vmem:[#allocation3 + $0x10] sm:$0xff]  ;;  %v826_v31 = vshrl.u32 %v94_v20, 7  ;;  %s430_s22 = sshll.u32 %s769_s21, 4  ;;  %s431_s22 = int_to_ptr.vmem [resolvable:$true] %s430_s22 }
  0x16   :  { %v615_v9 = vpack.c.bf16 %v44_v6, %v43_v4  ;;  %v617_v10 = vpack.c.bf16 %v62_v8, %v61_v7  ;;  %v46_v12 = vld [vmem:[#allocation3 + $0x18] sm:$0xff]  ;;  %v75_v13 = vld [vmem:[#allocation3 + $0x100] sm:$0xff]  ;;  %v76_v14 = vld [vmem:[#allocation3 + $0x108] sm:$0xff]  ;;  %p742_p9 = scmp.lt.s32.totalorder %s431_s22, %s431_s22 }
  0x17   :  { %614 = vmatprep.subr.bf16.mxu0 %v613_v5  ;;  %v63_v15 = vld [vmem:[#allocation3 + $0xa0] sm:$0xff]  ;;  %v64_v16 = vld [vmem:[#allocation3 + $0xa8] sm:$0xff]  ;;  %v619_v17 = vpack.c.bf16 %v46_v12, %v45_v11  ;;  %v646_v18 = vpack.c.bf16 %v76_v14, %v75_v13  ;;  %v77_v19 = vld [vmem:[#allocation3 + $0x110] sm:$0xff]  ;;  %v100_v41 = vsub.s32 1, %v826_v31  ;;  %v96_v13 = vsub.s32 0, %v826_v31 }
  0x18   :  { %616 = vmatpush3.bf16.msra.mxu0 %v615_v9  ;;  %v621_v21 = vpack.c.bf16 %v64_v16, %v63_v15  ;;  %v47_v22 = vld [vmem:[#allocation3 + $0x20] sm:$0xff]  ;;  %v48_v23 = vld [vmem:[#allocation3 + $0x28] sm:$0xff]  ;;  %v78_v24 = vld [vmem:[#allocation3 + $0x118] sm:$0xff] }
  0x19   :  { %618 = vmatprep.subr.bf16.mxu0 %v617_v10  ;;  %647 = vmatpush3.bf16.msra.mxu1 %v646_v18  ;;  %v649_v25 = vpack.c.bf16 %v78_v24, %v77_v19  ;;  %v65_v26 = vld [vmem:[#allocation3 + $0xb0] sm:$0xff]  ;;  %v66_v27 = vld [vmem:[#allocation3 + $0xb8] sm:$0xff]  ;;  %v79_v28 = vld [vmem:[#allocation3 + $0x120] sm:$0xff]  ;;  %v623_v30 = vpack.c.bf16 %v48_v23, %v47_v22 }
  0x1a   :  { %648 = vmatprep.subr.bf16.mxu1 %v766_v0  ;;  %v80_v29 = vld [vmem:[#allocation3 + $0x128] sm:$0xff]  ;;  %v625_v32 = vpack.c.bf16 %v66_v27, %v65_v26  ;;  %v49_v33 = vld [vmem:[#allocation3 + $0x30] sm:$0xff]  ;;  %v50_v34 = vld [vmem:[#allocation3 + $0x38] sm:$0xff] }
  0x1b   :  { %v652_v35 = vpack.c.bf16 %v80_v29, %v79_v28  ;;  %v67_v36 = vld [vmem:[#allocation3 + $0xc0] sm:$0xff]  ;;  %v68_v37 = vld [vmem:[#allocation3 + $0xc8] sm:$0xff]  ;;  %v81_v38 = vld [vmem:[#allocation3 + $0x130] sm:$0xff]  ;;  %v627_v40 = vpack.c.bf16 %v50_v34, %v49_v33 }
  0x1c   :  { %620 = vmatpush3.bf16.msra.mxu0 %v619_v17  ;;  %v82_v39 = vld [vmem:[#allocation3 + $0x138] sm:$0xff]  ;;  %v629_v42 = vpack.c.bf16 %v68_v37, %v67_v36  ;;  %v51_v43 = vld [vmem:[#allocation3 + $0x40] sm:$0xff]  ;;  %v52_v44 = vld [vmem:[#allocation3 + $0x48] sm:$0xff]  ;;  %v104_v17 = vsub.s32 2, %v826_v31 }
  0x1d   :  { %622 = vmatprep.subr.bf16.mxu0 %v621_v21  ;;  %650 = vmatpush3.bf16.msra.mxu1 %v649_v25  ;;  %v655_v45 = vpack.c.bf16 %v82_v39, %v81_v38  ;;  %v69_v46 = vld [vmem:[#allocation3 + $0xd0] sm:$0xff]  ;;  %v70_v47 = vld [vmem:[#allocation3 + $0xd8] sm:$0xff]  ;;  %v83_v48 = vld [vmem:[#allocation3 + $0x140] sm:$0xff]  ;;  %v631_v51 = vpack.c.bf16 %v52_v44, %v51_v43 }
  0x1e   :  { %651 = vmatprep.subr.bf16.mxu1 %v766_v0  ;;  %v84_v49 = vld [vmem:[#allocation3 + $0x148] sm:$0xff]  ;;  %v42_v50 = vld [vmem:[%s956_s0] sm:$0x7]  ;;  %v633_v53 = vpack.c.bf16 %v70_v47, %v69_v46  ;;  %v53_v54 = vld [vmem:[#allocation3 + $0x50] sm:$0xff] }
  0x1f   :  { %v101_v52 = vrot.slane %v42_v50, %v100_v41  ;;  %v54_v55 = vld [vmem:[#allocation3 + $0x58] sm:$0xff]  ;;  %v658_v56 = vpack.c.bf16 %v84_v49, %v83_v48  ;;  %v71_v57 = vld [vmem:[#allocation3 + $0xe0] sm:$0xff]  ;;  %v72_v58 = vld [vmem:[#allocation3 + $0xe8] sm:$0xff]  ;;  %v97_v21 = vrot.slane %v42_v50, %v96_v13  ;;  %v105_v23 = vrot.slane %v42_v50, %v104_v17 }
  0x20   :  { %624 = vmatpush3.bf16.msra.mxu0 %v623_v30  ;;  %v85_v59 = vld [vmem:[#allocation3 + $0x150] sm:$0xff]  ;;  %v86_v60 = vld [vmem:[#allocation3 + $0x158] sm:$0xff]  ;;  %v635_v61 = vpack.c.bf16 %v54_v55, %v53_v54  ;;  %v637_v62 = vpack.c.bf16 %v72_v58, %v71_v57  ;;  %v55_v63 = vld [vmem:[#allocation3 + $0x60] sm:$0xff]  ;;  %v92_v58 = vstv %s957_s1 }
  0x21   :  { %626 = vmatprep.subr.bf16.mxu0 %v625_v32  ;;  %653 = vmatpush3.bf16.msra.mxu1 %v652_v35  ;;  %v56_v2 = vld [vmem:[#allocation3 + $0x68] sm:$0xff]  ;;  %v661_v3 = vpack.c.bf16 %v86_v60, %v85_v59  ;;  %v73_v4 = vld [vmem:[#allocation3 + $0xf0] sm:$0xff]  ;;  %v74_v5 = vld [vmem:[#allocation3 + $0xf8] sm:$0xff] }
  0x22   :  { %654 = vmatprep.subr.bf16.mxu1 %v766_v0  ;;  %173 = vmatprep.mubr.f32.mxu0 %v101_v52  ;;  %v87_v6 = vld [vmem:[#allocation3 + $0x160] sm:$0xff]  ;;  %v88_v7 = vld [vmem:[#allocation3 + $0x168] sm:$0xff]  ;;  %v639_v8 = vpack.c.bf16 %v56_v2, %v55_v63  ;;  %v641_v9 = vpack.c.bf16 %v74_v5, %v73_v4  ;;  %v57_v10 = vld [vmem:[#allocation3 + $0x70] sm:$0xff] }
  0x23   :  { %v58_v11 = vld [vmem:[#allocation3 + $0x78] sm:$0xff]  ;;  %v664_v12 = vpack.c.bf16 %v88_v7, %v87_v6  ;;  %v89_v14 = vld [vmem:[#allocation3 + $0x170] sm:$0xff]  ;;  %v250_v18 = vld [vmem:[%s959_s3] sm:$0xff] }
  0x24   :  { %628 = vmatpush3.bf16.msra.mxu0 %v627_v40  ;;  %v90_v15 = vld [vmem:[#allocation3 + $0x178] sm:$0xff]  ;;  %v643_v16 = vpack.c.bf16 %v58_v11, %v57_v10  ;;  %v251_v19 = vld [vmem:[%s959_s3 + $0x8] sm:$0xff]  ;;  %v252_v24 = vld [vmem:[%s959_s3 + $0x10] sm:$0xff] }
  0x25   :  { %630 = vmatprep.subr.bf16.mxu0 %v629_v42  ;;  %656 = vmatpush3.bf16.msra.mxu1 %v655_v45  ;;  %v667_v20 = vpack.c.bf16 %v90_v15, %v89_v14  ;;  %v670_v22 = vpack.c.bf16 %v251_v19, %v250_v18  ;;  %v253_v25 = vld [vmem:[%s959_s3 + $0x18] sm:$0xff]  ;;  %v254_v27 = vld [vmem:[%s959_s3 + $0x20] sm:$0xff]  ;;  %v255_v28 = vld [vmem:[%s959_s3 + $0x28] sm:$0xff] }
  0x26   :  { %657 = vmatprep.subr.bf16.mxu1 %v766_v0  ;;  %v673_v26 = vpack.c.bf16 %v253_v25, %v252_v24  ;;  %v676_v29 = vpack.c.bf16 %v255_v28, %v254_v27  ;;  %v256_v30 = vld [vmem:[%s959_s3 + $0x30] sm:$0xff]  ;;  %v257_v31 = vld [vmem:[%s959_s3 + $0x38] sm:$0xff]  ;;  %v259_v33 = vld [vmem:[%s959_s3 + $0x48] sm:$0xff] }
  0x27   :  { %v679_v32 = vpack.c.bf16 %v257_v31, %v256_v30  ;;  %v260_v35 = vld [vmem:[%s959_s3 + $0x50] sm:$0xff]  ;;  %v261_v36 = vld [vmem:[%s959_s3 + $0x58] sm:$0xff]  ;;  %v262_v38 = vld [vmem:[%s959_s3 + $0x60] sm:$0xff] }
  0x28   :  { %632 = vmatpush3.bf16.msra.mxu0 %v631_v51  ;;  %v685_v37 = vpack.c.bf16 %v261_v36, %v260_v35  ;;  %v263_v39 = vld [vmem:[%s959_s3 + $0x68] sm:$0xff]  ;;  %v264_v41 = vld [vmem:[%s959_s3 + $0x70] sm:$0xff]  ;;  %v265_v42 = vld [vmem:[%s959_s3 + $0x78] sm:$0xff] }
  0x29   :  { %634 = vmatprep.subr.bf16.mxu0 %v633_v53  ;;  %659 = vmatpush3.bf16.msra.mxu1 %v658_v56  ;;  %v688_v40 = vpack.c.bf16 %v263_v39, %v262_v38  ;;  %v691_v43 = vpack.c.bf16 %v265_v42, %v264_v41  ;;  %v338_v44 = vld [vmem:[%s961_s5] sm:$0xff]  ;;  %v339_v45 = vld [vmem:[%s961_s5 + $0x8] sm:$0xff]  ;;  %v340_v46 = vld [vmem:[%s961_s5 + $0x10] sm:$0xff] }
  0x2a   :  { %660 = vmatprep.subr.bf16.mxu1 %v766_v0  ;;  %v694_v47 = vpack.c.bf16 %v339_v45, %v338_v44  ;;  %v341_v48 = vld [vmem:[%s961_s5 + $0x18] sm:$0xff]  ;;  %v342_v50 = vld [vmem:[%s961_s5 + $0x20] sm:$0xff]  ;;  %v343_v51 = vld [vmem:[%s961_s5 + $0x28] sm:$0xff] }
  0x2b   :  { %v697_v49 = vpack.c.bf16 %v341_v48, %v340_v46  ;;  %v700_v52 = vpack.c.bf16 %v343_v51, %v342_v50  ;;  %v344_v53 = vld [vmem:[%s961_s5 + $0x30] sm:$0xff]  ;;  %v345_v54 = vld [vmem:[%s961_s5 + $0x38] sm:$0xff]  ;;  %v266_v5 = vld [vmem:[%s960_s4] sm:$0x1]  ;;  %s741_s4 = scalar_lea.vmem %s431_s22, 32 }
  0x2c   :  { %636 = vmatpush3.bf16.msra.mxu0 %v635_v61  ;;  %v703_v55 = vpack.c.bf16 %v345_v54, %v344_v53  ;;  %v348_v10 = vld [vmem:[%s962_s6] sm:$0x1] }
  0x2d   :  { %638 = vmatprep.subr.bf16.mxu0 %v637_v62  ;;  %662 = vmatpush3.bf16.msra.mxu1 %v661_v3  ;;  %v346_v3 = vld [vmem:[%s961_s5 + $0x40] sm:$0xff] }
  0x2e   :  { %663 = vmatprep.subr.bf16.mxu1 %v766_v0 }
  0x30   :  { %640 = vmatpush3.bf16.msra.mxu0 %v639_v8 }
  0x31   :  { %642 = vmatprep.subr.bf16.mxu0 %v641_v9  ;;  %665 = vmatpush3.bf16.msra.mxu1 %v664_v12 }
  0x32   :  { %666 = vmatprep.subr.bf16.mxu1 %v766_v0 }
  0x34   :  { %644 = vmatpush3.bf16.msra.mxu0 %v643_v16 }
  0x35   :  { %669 = vmatprep.subr.bf16.mxu0 %v766_v0  ;;  %668 = vmatpush3.bf16.msra.mxu1 %v667_v20 }
  0x36   :  { %693 = vmatprep.subr.bf16.mxu1 %v766_v0 }
  0x37   :  { %174 = vmatmul.mubr.f32.vlgmr.msra.gmra.mrb[0].mxu0 %v97_v21 }
  0x38   :  { %671 = vmatpush3.bf16.msra.mxu0 %v670_v22  ;;  %587 = vmatprep.mubr.msk.f32.mxu0 %vm767_vm0, %v768_v1 }
  0x39   :  { %553 = vmatmul.mubr.f32.vlgmr.msra.gmra.mrb[0].mxu1 %v105_v23  ;;  %672 = vmatprep.subr.bf16.mxu0 %v766_v0 }
  0x3a   :  { %610 = vmatprep.mubr.msk.f32.mxu1 %vm767_vm0, %v768_v1  ;;  %v258_v1 = vld [vmem:[%s959_s3 + $0x40] sm:$0xff]  ;;  %695 = vmatpush3.bf16.msra.mxu1 %v694_v47 }
  0x3b   :  { %v682_v34 = vpack.c.bf16 %v259_v33, %v258_v1  ;;  %696 = vmatprep.subr.bf16.mxu1 %v766_v0 }
  0x3c   :  { %674 = vmatpush3.bf16.msra.mxu0 %v673_v26 }
  0x3d   :  { %675 = vmatprep.subr.bf16.mxu0 %v766_v0 }
  0x3e   :  { %698 = vmatpush3.bf16.msra.mxu1 %v697_v49 }
  0x3f   :  { %699 = vmatprep.subr.bf16.mxu1 %v766_v0 }
  0x40   :  { %677 = vmatpush3.bf16.msra.mxu0 %v676_v29 }
  0x41   :  { %678 = vmatprep.subr.bf16.mxu0 %v766_v0 }
  0x42   :  { %701 = vmatpush3.bf16.msra.mxu1 %v700_v52 }
  0x43   :  { %702 = vmatprep.subr.bf16.mxu1 %v766_v0 }
  0x44   :  { %680 = vmatpush3.bf16.msra.mxu0 %v679_v32 }
  0x45   :  { %681 = vmatprep.subr.bf16.mxu0 %v766_v0 }
  0x46   :  { %704 = vmatpush3.bf16.msra.mxu1 %v703_v55 }
  0x47   :  { %705 = vmatprep.subr.bf16.mxu1 %v766_v0 }
  0x48   :  { %683 = vmatpush3.bf16.msra.mxu0 %v682_v34 }
  0x49   :  { %684 = vmatprep.subr.bf16.mxu0 %v766_v0 }
  0x4c   :  { %686 = vmatpush3.bf16.msra.mxu0 %v685_v37 }
  0x4d   :  { %687 = vmatprep.subr.bf16.mxu0 %v766_v0 }
  0x50   :  { %689 = vmatpush3.bf16.msra.mxu0 %v688_v40 }
  0x51   :  { %690 = vmatprep.subr.bf16.mxu0 %v766_v0  ;;  %v347_v0 = vld [vmem:[%s961_s5 + $0x48] sm:$0xff]  ;;  %s737_s5 = scalar_lea.vmem %s431_s22, 16 }
  0x52   :  { %v706_v4 = vpack.c.bf16 %v347_v0, %v346_v3  ;;  %p738_p8 = scmp.ne.s32.totalorder %s431_s22, %s737_s5  ;;  %p743_p10 = scmp.lt.s32.totalorder %s741_s4, %s737_s5 }
  0x54   :  { %692 = vmatpush3.bf16.msra.mxu0 %v691_v43  ;;  %707 = vmatpush3.bf16.msra.mxu1 %v706_v4  ;;  %p744_p11 = por %p743_p10, %p742_p9 }
  0x56   :  { %p745_p12 = pnand %p744_p11, %p738_p8 }
 0x10a   :  { %v472_v56 = vpop.f32.mrb[0].mxu0 }
 0x10b   :  { %v473_v57 = vpop.f32.mrb[1].mxu0 }
 0x10c   :  { %v474_v59 = vadd.f32 %v473_v57, %v472_v56  ;;  %v245_v60 = vpop.f32.mrb[0].mxu1 }
 0x10d   :  { %v554_v61 = vpop.f32.mrb[1].mxu1 }
 0x10e   :  { %v176_v62 = vadd.f32 %v474_v59, %v92_v58 }
 0x110   :  { %v246_v63 = vadd.f32 %v245_v60, %v176_v62 }
 0x112   :  { %v249_v2 = vmax.f32 %v246_v63, 0.0 }
 0x114   :  { %588 = vmatmul.mubr.f32.vlgmr.msra.gmra.mrb[2].mxu0 %v249_v2 }
 0x1e7   :  { %v333_v6 = vpop.f32.mrb[2].mxu0 }
 0x1e8   :  { %v334_v7 = vadd.f32 %v333_v6, %v266_v5  ;;  %v589_v8 = vpop.f32.mrb[3].mxu0 }
 0x1ea   :  { %v337_v9 = vmax.f32 %v334_v7, 0.0 }
 0x1ec   :  { %611 = vmatmul.mubr.msk.f32.vlgmr.msra.gmra.mrb[2].mxu1 %vm349_vm1, %v337_v9 }
 0x2bf   :  { %v419_v11 = vpop.f32.mrb[2].mxu1 }
 0x2c0   :  { %v420_v12 = vadd.f32 %v419_v11, %v348_v10  ;;  %v612_v13 = vpop.f32.mrb[3].mxu1 }
 0x2c2   :  { %423 = vst [vmem:[#allocation6] sm:$0x1] %v420_v12 }
 0x2c3   :  { %748 = shalt.err (!%p745_p12)
}
 0x2c4   :  { %s749_s25 = scalar_lea.hbm %s963_s7, 16 }
 0x2c5   :  { %p750_p13 = scmp.ne.s32.totalorder %s963_s7, %s749_s25  ;;  %p753_p0 = scmp.lt.u32.totalorder %s749_s25, %s963_s7 }
 0x2c7   :  { %p755_p1 = pnand %p753_p0, %p750_p13 }
 0x2c9   :  { %758 = shalt.err (!%p755_p1)
}
 0x2ca   :  { %433 = dma.vmem_to_hbm [thread:$0]  %s431_s22, 16, %s963_s7, [#allocation5]  }
 0x2cb   :  { %761 = dma.done.wait [#allocation5], 16  }
 0x2cc   :  { %762 = vsyncadd [#allocation5], 4294967280 }
 0x2cd   :  { %437 = vsyncpa [#allocation4], 1 }
 0x2ce   :  { %438 = vsyncpa [#allocation5], 1 }

</bundles_post_ra>
